<compile_context>
chip_gen: v6e
topology: v6e:2x2x1
jax: 0.10.0
libtpu: 0.0.40
codegen_flags: <defaults>
</compile_context>

<pallas_src>
import jax
import jax.numpy as jnp
from jax.experimental import pallas as pl
from jax.experimental.pallas import tpu as pltpu


HIDDEN = 10        # Linear_QNet hidden width (fixed by the module)
OUT_FEATURES = 4   # Linear_QNet output width (fixed by the module)
SUBLANE = 8        # f32 sublane granularity for tiled blocks
MIN_SPLIT = 256    # rows per tile before it's worth splitting the grid (megacore)


def _round_up(n, m):
    return ((n + m - 1) // m) * m


def qnet_kernel(x_ref, w1_ref, b1_ref, w2_ref, b2_ref, out_ref):
    # Layer 1 on the MXU: (tb, in) f32 @ (in, 10) f32 -> f32 accumulate.
    h = jnp.dot(x_ref[...], w1_ref[...], preferred_element_type=jnp.float32)
    h = jnp.maximum(h + b1_ref[...], 0.0)                 # bias + ReLU (VPU, f32)
    # Layer 2: (tb, 10) @ (10, 4). Kernel is HBM-bound; MXU shape is irrelevant.
    y = jnp.dot(h, w2_ref[...], preferred_element_type=jnp.float32)
    out_ref[...] = (y + b2_ref[...]).astype(out_ref.dtype)   # narrow (tb, 4) store


def prepare_params(w1, b1, w2, b2):
    """One-time parameter prep (hoisted out of the per-call forward):
    transpose to (in, hidden) / (hidden, out) and make biases 2-D row vectors."""
    return (
        w1.T.astype(jnp.float32),               # (in, 10)
        b1.reshape(1, -1).astype(jnp.float32),  # (1, 10)
        w2.T.astype(jnp.float32),               # (10, 4)
        b2.reshape(1, -1).astype(jnp.float32),  # (1, 4)
    )


def _choose_tiling(batch, tile_b):
    """Pad batch only to the sublane granule, then pick a tile that divides the
    padded batch exactly (waste <= steps * 7 rows, never a 2x blow-up)."""
    b8 = _round_up(max(batch, SUBLANE), SUBLANE)
    steps = pl.cdiv(b8, tile_b)
    if steps == 1 and b8 >= 2 * MIN_SPLIT:
        steps = 2          # give v7x's two TensorCores something to split
    tb = _round_up(pl.cdiv(b8, steps), SUBLANE)
    return tb, tb * steps, steps


def linear_qnet_forward(x, prepared, *, tile_b=2048):
    """x: (B, in) f32; prepared = prepare_params(w1, b1, w2, b2) -> (B, 4) f32."""
    w1_t, b1_2d, w2_t, b2_2d = prepared
    batch, in_features = x.shape
    hidden = w1_t.shape[1]
    out_features = w2_t.shape[1]

    tb, b_pad, steps = _choose_tiling(batch, tile_b)
    x_in = x if b_pad == batch else jnp.pad(x, ((0, b_pad - batch), (0, 0)))

    # Weights/biases stay VMEM-resident across all batch tiles (constant index_map).
    def resident(a):
        return pl.BlockSpec(a.shape, lambda i: (0, 0))

    cost = pl.CostEstimate(
        flops=2 * b_pad * (in_features * hidden + hidden * out_features),
        transcendentals=0,
        bytes_accessed=4 * (x_in.size + b_pad * out_features
                            + w1_t.size + b1_2d.size + w2_t.size + b2_2d.size),
    )

    out = pl.pallas_call(
        qnet_kernel,
        out_shape=jax.ShapeDtypeStruct((b_pad, out_features), jnp.float32),
        grid=(steps,),
        in_specs=[
            pl.BlockSpec((tb, in_features), lambda i: (i, 0)),   # streamed x tiles
            resident(w1_t),
            resident(b1_2d),
            resident(w2_t),
            resident(b2_2d),
        ],
        out_specs=pl.BlockSpec((tb, out_features), lambda i: (i, 0)),
        compiler_params=pltpu.CompilerParams(
            dimension_semantics=("parallel",),   # shard batch tiles across TCs (v7x)
        ),
        cost_estimate=cost,
    )(x_in, w1_t, b1_2d, w2_t, b2_2d)

    return out[:batch]


def init_params(key, inputsize, hidden=HIDDEN, outsize=OUT_FEATURES):
    """Deterministic init mirroring torch.nn.Linear default U(-1/sqrt(fan_in), 1/sqrt(fan_in))."""
    k1, k2, k3, k4 = jax.random.split(key, 4)
    bound1 = 1.0 / jnp.sqrt(inputsize)
    bound2 = 1.0 / jnp.sqrt(hidden)
    w1 = jax.random.uniform(k1, (hidden, inputsize), jnp.float32, -bound1, bound1)
    b1 = jax.random.uniform(k2, (hidden,), jnp.float32, -bound1, bound1)
    w2 = jax.random.uniform(k3, (outsize, hidden), jnp.float32, -bound2, bound2)
    b2 = jax.random.uniform(k4, (outsize,), jnp.float32, -bound2, bound2)
    return w1, b1, w2, b2


if __name__ == "__main__":
    key = jax.random.PRNGKey(0)
    kx, kp = jax.random.split(key)

    # Small shapes consistent with the module (e.g. an 11-dim RL game state).
    batch, inputsize = 2, 11
    x = jax.random.normal(kx, (batch, inputsize), jnp.float32)
    w1, b1, w2, b2 = init_params(kp, inputsize)

    prepared = prepare_params(w1, b1, w2, b2)   # one-time param prep (hoisted)
    fwd = jax.jit(linear_qnet_forward)

    out = jax.block_until_ready(fwd(x, prepared))

    # Pure-JAX f32 reference (kernel is all-f32, so tolerance is tight).
    ref = jnp.maximum(x @ w1.T + b1, 0.0) @ w2.T + b2
    assert out.shape == (batch, OUT_FEATURES)
    assert jnp.allclose(out, ref, atol=1e-4, rtol=1e-4), "mismatch vs reference"

    # Larger batch that is not sublane/tile aligned: exercises the padded,
    # multi-tile (2-step, megacore-shardable) path through the same kernel.
    big_x = jax.random.normal(kx, (1000, inputsize), jnp.float32)
    big_out = jax.block_until_ready(fwd(big_x, prepared))
    big_ref = jnp.maximum(big_x @ w1.T + b1, 0.0) @ w2.T + b2
    assert big_out.shape == (1000, OUT_FEATURES)
    assert jnp.allclose(big_out, big_ref, atol=1e-4, rtol=1e-4), "mismatch (large batch)"

    # TODO(synk): Linear_QNet.save() is host-side torch.save file I/O, not a kernel op.
    print("KERNEL_OK")
</pallas_src>

<mosaic_0001>
module attributes {stable_mosaic.version = 11 : i64} {
  func.func @qnet_kernel(%arg0: i32, %arg1: memref<8x11xf32, #tpu.memory_space<vmem>>, %arg2: memref<11x10xf32, #tpu.memory_space<vmem>>, %arg3: memref<1x10xf32, #tpu.memory_space<vmem>>, %arg4: memref<10x4xf32, #tpu.memory_space<vmem>>, %arg5: memref<1x4xf32, #tpu.memory_space<vmem>>, %arg6: memref<8x4xf32, #tpu.memory_space<vmem>>) attributes {dimension_semantics = [#tpu.dimension_semantics<parallel>], iteration_bounds = array<i64: 1>, scalar_prefetch = 0 : i64, scratch_operands = 0 : i64, tpu.core_type = #tpu.core_type<tc>, window_params = [{transform_indices = @transform_0, window_bounds = array<i64: 8, 11>}, {pipeline_mode = #tpu.pipeline_mode<synchronous>, transform_indices = @transform_1, window_bounds = array<i64: 11, 10>}, {pipeline_mode = #tpu.pipeline_mode<synchronous>, transform_indices = @transform_2, window_bounds = array<i64: 1, 10>}, {pipeline_mode = #tpu.pipeline_mode<synchronous>, transform_indices = @transform_3, window_bounds = array<i64: 10, 4>}, {pipeline_mode = #tpu.pipeline_mode<synchronous>, transform_indices = @transform_4, window_bounds = array<i64: 1, 4>}, {transform_indices = @transform_5, window_bounds = array<i64: 8, 4>}]} {
    %c0 = arith.constant 0 : index
    %c0_0 = arith.constant 0 : index
    %0 = vector.load %arg1[%c0, %c0_0] : memref<8x11xf32, #tpu.memory_space<vmem>>, vector<8x11xf32>
    %c0_1 = arith.constant 0 : index
    %c0_2 = arith.constant 0 : index
    %1 = vector.load %arg2[%c0_1, %c0_2] : memref<11x10xf32, #tpu.memory_space<vmem>>, vector<11x10xf32>
    %cst = arith.constant dense<0.000000e+00> : vector<8x10xf32>
    %2 = tpu.matmul %0, %1, %cst {dimension_numbers = #tpu.dot_dimension_numbers<[1], [0], [0], [1], [0, 0, 1, 1], [], []>} : vector<8x11xf32>, vector<11x10xf32>, vector<8x10xf32> -> vector<8x10xf32>
    %c0_3 = arith.constant 0 : index
    %c0_4 = arith.constant 0 : index
    %3 = vector.load %arg3[%c0_3, %c0_4] : memref<1x10xf32, #tpu.memory_space<vmem>>, vector<1x10xf32>
    %4 = vector.broadcast %3 : vector<1x10xf32> to vector<8x10xf32>
    %5 = arith.addf %2, %4 : vector<8x10xf32>
    %cst_5 = arith.constant 0.000000e+00 : f32
    %6 = vector.broadcast %cst_5 : f32 to vector<8x10xf32>
    %7 = arith.maximumf %5, %6 : vector<8x10xf32>
    %c0_6 = arith.constant 0 : index
    %c0_7 = arith.constant 0 : index
    %8 = vector.load %arg4[%c0_6, %c0_7] : memref<10x4xf32, #tpu.memory_space<vmem>>, vector<10x4xf32>
    %cst_8 = arith.constant dense<0.000000e+00> : vector<8x4xf32>
    %9 = tpu.matmul %7, %8, %cst_8 {dimension_numbers = #tpu.dot_dimension_numbers<[1], [0], [0], [1], [0, 0, 1, 1], [], []>} : vector<8x10xf32>, vector<10x4xf32>, vector<8x4xf32> -> vector<8x4xf32>
    %c0_9 = arith.constant 0 : index
    %c0_10 = arith.constant 0 : index
    %10 = vector.load %arg5[%c0_9, %c0_10] : memref<1x4xf32, #tpu.memory_space<vmem>>, vector<1x4xf32>
    %11 = vector.broadcast %10 : vector<1x4xf32> to vector<8x4xf32>
    %12 = arith.addf %9, %11 : vector<8x4xf32>
    %c0_11 = arith.constant 0 : index
    %c0_12 = arith.constant 0 : index
    %13 = vector.load %arg6[%c0_11, %c0_12] : memref<8x4xf32, #tpu.memory_space<vmem>>, vector<8x4xf32>
    tpu.vector_store %arg6[%c0_11, %c0_12], %12 {strides = array<i32>} : memref<8x4xf32, #tpu.memory_space<vmem>>, vector<8x4xf32>,
    return
  }
  func.func @transform_0(%arg0: i32) -> (i32, i32) {
    %c0_i32 = arith.constant 0 : i32
    %c0_i32_0 = arith.constant 0 : i32
    return %arg0, %c0_i32 : i32, i32
  }
  func.func @transform_1(%arg0: i32) -> (i32, i32) {
    %c0_i32 = arith.constant 0 : i32
    %c0_i32_0 = arith.constant 0 : i32
    %c0_i32_1 = arith.constant 0 : i32
    return %c0_i32, %c0_i32_0 : i32, i32
  }
  func.func @transform_2(%arg0: i32) -> (i32, i32) {
    %c0_i32 = arith.constant 0 : i32
    %c0_i32_0 = arith.constant 0 : i32
    %c0_i32_1 = arith.constant 0 : i32
    return %c0_i32, %c0_i32_0 : i32, i32
  }
  func.func @transform_3(%arg0: i32) -> (i32, i32) {
    %c0_i32 = arith.constant 0 : i32
    %c0_i32_0 = arith.constant 0 : i32
    %c0_i32_1 = arith.constant 0 : i32
    return %c0_i32, %c0_i32_0 : i32, i32
  }
  func.func @transform_4(%arg0: i32) -> (i32, i32) {
    %c0_i32 = arith.constant 0 : i32
    %c0_i32_0 = arith.constant 0 : i32
    %c0_i32_1 = arith.constant 0 : i32
    return %c0_i32, %c0_i32_0 : i32, i32
  }
  func.func @transform_5(%arg0: i32) -> (i32, i32) {
    %c0_i32 = arith.constant 0 : i32
    %c0_i32_0 = arith.constant 0 : i32
    return %arg0, %c0_i32 : i32, i32
  }
}

</mosaic_0001>

<bundles_post_ra>
// kernel: linear_qnet_forward.1
= control target key start
LH: loop header
LB: loop body
LE: loop exit
PB: predicated region body
PF: predicated region fallthrough
CT: control target
= control target key end

     0   :  { %vm34_vm0 = vcmask 1042432   ;;  %v230_v0 = vmov 0.0   ;;  %vm231_vm1 = vmmov 0   ;;  %vm30_vm2 = vcmask 89088   ;;  %s286_s1 = inlined_call_operand.vmem [shape: f32[11,10], index: 1, kind: input, shape index: {}]   ;;  %s287_s0 = inlined_call_operand.vmem [shape: f32[8,11], index: 0, kind: input, shape index: {}]   ;;  %s288_s3 = inlined_call_operand.vmem [shape: f32[10,4], index: 3, kind: input, shape index: {}]   ;;  %s289_s2 = inlined_call_operand.vmem [shape: f32[1,10], index: 2, kind: input, shape index: {}]   ;;  %s290_s4 = inlined_call_operand.vmem [shape: f32[1,4], index: 4, kind: input, shape index: {}]   ;;  %s291_s5 = inlined_call_operand.vmem [shape: f32[8,4], index: 5, kind: output, shape index: {}]  }
   0x1   :  { %214 = vmatprep.subr.mxu0 %v230_v0  ;;  %v22_v1 = vld [vmem:[%s286_s1 + $0x8] sm:$0x7]  ;;  %v21_v2 = vld [vmem:[%s286_s1] sm:$0xff]  ;;  %218 = vmatprep.mubr.msk.f32.mxu0 %vm231_vm1, %v230_v0  ;;  %vm122_vm3 = vcmask 1041408   ;;  %vm118_vm4 = vcmask 80896   ;;  %vm196_vm5 = vcmask 31744  }
   0x2   :  { %215 = vmatpush3.msk.msra.mxu0 %vm34_vm0, %v22_v1  ;;  %v20_v3 = vld [vmem:[%s287_s0] sm:$0xff]  ;;  %221 = vmatprep.subr.mxu1 %v230_v0  ;;  %v110_v4 = vld [vmem:[%s288_s3 + $0x8] sm:$0x3] }
   0x3   :  { %216 = vmatprep.subr.mxu0 %v230_v0  ;;  %225 = vmatprep.mubr.msk.f32.mxu1 %vm231_vm1, %v230_v0  ;;  %v109_v5 = vld [vmem:[%s288_s3] sm:$0xff] }
   0x4   :  { %217 = vmatpush3.msra.mxu0 %v21_v2  ;;  %222 = vmatpush3.msk.msra.mxu1 %vm122_vm3, %v110_v4  ;;  %v202_v6 = vld [vmem:[%s289_s2] ss:$0 sm:$0xff] }
   0x5   :  { %219 = vmatmul.mubr.msk.f32.vlgmr.msra.gmra.mxu0 %vm30_vm2, %v20_v3  ;;  %223 = vmatprep.subr.mxu1 %v230_v0  ;;  %v205_v11 = vld [vmem:[%s290_s4] ss:$0 sm:$0xff] }
   0x6   :  { %224 = vmatpush3.msra.mxu1 %v109_v5 }
  0xc5   :  { %v104_v7 = vpop.f32.mrf.mxu0 }
  0xc6   :  { %v105_v8 = vadd.f32 %v202_v6, %v104_v7 }
  0xc7   :  { %v220_v9 = vpop.f32.mrf.mxu0 }
  0xc8   :  { %v108_v10 = vmax.f32 %v105_v8, 0.0 }
  0xca   :  { %226 = vmatmul.mubr.msk.f32.vlgmr.msra.gmra.mxu1 %vm118_vm4, %v108_v10 }
 0x18a   :  { %v192_v12 = vpop.f32.mrf.mxu1 }
 0x18b   :  { %v193_v13 = vadd.f32 %v205_v11, %v192_v12 }
 0x18c   :  { %v227_v14 = vpop.f32.mrf.mxu1 }
 0x18d   :  { %197 = vst.msk [vmem:[%s291_s5] sm:$0xff] %vm196_vm5, %v193_v13 }

</bundles_post_ra>
